<compile_context>
chip_gen: v7x
topology: tpu7x:2x2x1
jax: 0.10.0
libtpu: 0.0.40
codegen_flags: <defaults>
</compile_context>

<pallas_src>
import functools
import math

import jax
import jax.numpy as jnp
from jax import lax
from jax.experimental import pallas as pl
from jax.experimental.pallas import tpu as pltpu


def _channel_fc_kernel(x_ref, w_ref, b_ref, o_ref, *scratch, pack, precision):
    """One (feature-group, batch-tile) grid step.

    x_ref: (TB, G*C)  lane-dense activations for G features.
    w_ref: (G, C, C)  per-feature weights, PyTorch (out, in) layout.
    b_ref: (1, G*C)   lane-dense bias slab.
    o_ref: (TB, G*C)  lane-dense output slab.
    scratch: (wp_ref,) with wp_ref (G//pack, pack*C, pack*C) iff pack > 1.
    """
    G, C, _ = w_ref.shape

    if pack > 1:
        wp_ref, = scratch
        q_blocks = G // pack
        K = pack * C                      # 128: full MXU K/N and lane width

        # Build the block-diagonal packed weights once per feature group and
        # keep them resident across the inner batch grid axis (the batch axis
        # is marked "arbitrary" so every core sees batch step 0 first).
        @pl.when(pl.program_id(1) == 0)
        def _build_packed():
            wp_ref[...] = jnp.zeros(wp_ref.shape, wp_ref.dtype)
            for q in range(q_blocks):
                for p in range(pack):
                    wp_ref[q, p * C:(p + 1) * C, p * C:(p + 1) * C] = (
                        w_ref[q * pack + p])

        n_mm = q_blocks

        def get_w(q):
            return wp_ref[q]              # (K, K) block-diagonal, (out, in)
    else:
        n_mm = G
        K = C

        def get_w(g):
            return w_ref[g]               # (C, C), (out, in)

    # Per-chunk matmul + bias + cast + store straight into o_ref: live
    # accumulators are bounded to one (TB, K) tile and every chunk is
    # 128-lane aligned whenever K % 128 == 0 (always true on the packed path).
    for q in range(n_mm):
        lo, hi = q * K, (q + 1) * K
        acc = lax.dot_general(
            x_ref[:, lo:hi], get_w(q),
            dimension_numbers=(((1,), (1,)), ((), ())),   # x @ W.T
            preferred_element_type=jnp.float32,           # f32 MXU accumulate
            precision=precision,
        )
        acc = acc + b_ref[:, lo:hi].astype(jnp.float32)
        o_ref[:, lo:hi] = acc.astype(o_ref.dtype)


def _vmem_budgets():
    """(per-step block budget, vmem_limit_bytes), derived from this
    generation's VMEM capacity (64 MiB on v7x, 128 MiB on v5e/v6e)."""
    cap = 64 * 1024 * 1024                         # conservative default (v7x)
    try:
        info = pltpu.get_tpu_info()
        cap = int(getattr(info, "vmem_capacity_bytes", cap) or cap)
    except Exception:
        pass
    return int(cap * 0.50), int(cap * 0.75)


def _weight_block_bytes(g, C, pack, w_bytes):
    lane_pad = 128 if C < 128 else C               # VMEM lane padding of (.., C, C)
    dense = 2 * g * C * lane_pad * w_bytes         # double-buffered weight block
    packed = (g // pack) * (pack * C) ** 2 * w_bytes if pack > 1 else 0
    return dense + packed


def _choose_feature_group(F, C, pack, w_bytes, weight_budget):
    """Largest feature-group size G that (a) divides F, (b) is a multiple of
    the packing factor, (c) keeps G*C a multiple of 128 (lane-dense stores),
    (d) fits the weight VMEM budget, and (e) leaves >=4 (else >=2) feature
    grid steps for megacore sharding and DMA/compute overlap."""
    cands = [g for g in range(pack, F + 1, pack)
             if F % g == 0 and (g * C) % 128 == 0
             and _weight_block_bytes(g, C, pack, w_bytes) <= weight_budget]
    if not cands:
        # TODO(synk): pad F (and F*C) to an aligned size instead of falling
        # back to the full feature extent.
        return F
    for min_steps in (4, 2, 1):
        ok = [g for g in cands if F // g >= min_steps]
        if ok:
            return max(ok)
    return max(cands)


def _choose_batch_tile(B, G, C, x_bytes, act_budget):
    """Largest sublane-aligned batch tile that divides B and whose
    double-buffered x/out blocks fit the remaining VMEM budget."""
    def foot(tb):
        return 2 * 2 * tb * G * C * x_bytes        # x + out, double-buffered

    div8 = [t for t in range(8, B + 1, 8) if B % t == 0]
    fitting = [t for t in div8 if foot(t) <= act_budget]
    if fitting:
        return max(fitting)
    if div8:
        return min(div8)                           # smallest aligned tile
    # TODO(synk): pad B to a multiple of 8 instead of a full-extent block.
    return B


def channel_fc(x, weights, biases, *, precision=None):
    """ChannelFC forward.

    x:       (B, F, C)  activations, PyTorch layout.
    weights: (F, C, C)  per-feature nn.Linear weights, (out, in) layout.
    biases:  (F, C)     per-feature nn.Linear biases.
    precision: optional lax.Precision for the MXU matmuls (None = DEFAULT;
               HIGHEST costs 3-6x MXU passes for f32 operands).
    returns  (B, F, C)  out[b, f, :] = x[b, f, :] @ weights[f].T + biases[f].
    """
    B, F, C = x.shape
    assert weights.shape == (F, C, C)
    assert biases.shape == (F, C)

    # Match param dtypes to the activation dtype at the call boundary so the
    # kernel never silently promotes (pass bf16 activations + params for the
    # narrow-weight fast path).  TODO(synk): fp8 weights on v7x.
    if weights.dtype != x.dtype:
        weights = weights.astype(x.dtype)
    if biases.dtype != x.dtype:
        biases = biases.astype(x.dtype)

    # Feature packing factor: pack 128 // C features per MXU call when C < 128.
    pack = 128 // C if (C < 128 and 128 % C == 0) else 1

    block_budget, vmem_limit = _vmem_budgets()
    w_bytes = weights.dtype.itemsize
    G = _choose_feature_group(F, C, pack, w_bytes,
                              weight_budget=block_budget // 3)
    if G % pack != 0:
        pack = 1                                   # unaligned fallback group
    TB = _choose_batch_tile(
        B, G, C, x.dtype.itemsize,
        act_budget=block_budget - _weight_block_bytes(G, C, pack, w_bytes))

    grid = (F // G, B // TB)                       # feature outer, batch inner

    scratch = []
    if pack > 1:
        scratch.append(
            pltpu.VMEM((G // pack, pack * C, pack * C), weights.dtype))

    kernel = functools.partial(_channel_fc_kernel, pack=pack,
                               precision=precision)

    # Free contiguous reshapes: lane-dense slabs, no extra HBM transposes.
    x_flat = x.reshape(B, F * C)
    b_flat = biases.reshape(1, F * C)

    # The batch axis must run in-order when the packed-weight cache is built
    # at batch step 0; otherwise both axes are independent ("parallel").
    batch_sem = "arbitrary" if pack > 1 else "parallel"

    out_flat = pl.pallas_call(
        kernel,
        out_shape=jax.ShapeDtypeStruct((B, F * C), x.dtype),
        grid_spec=pltpu.PrefetchScalarGridSpec(
            num_scalar_prefetch=0,
            grid=grid,
            in_specs=[
                pl.BlockSpec((TB, G * C), lambda i, b: (b, i)),
                pl.BlockSpec((G, C, C), lambda i, b: (i, 0, 0)),  # resident over b
                pl.BlockSpec((1, G * C), lambda i, b: (0, i)),
            ],
            out_specs=pl.BlockSpec((TB, G * C), lambda i, b: (b, i)),
            scratch_shapes=scratch,
        ),
        compiler_params=pltpu.CompilerParams(
            dimension_semantics=("parallel", batch_sem),
            vmem_limit_bytes=vmem_limit,
        ),
    )(x_flat, weights, b_flat)

    return out_flat.reshape(B, F, C)


def init_params(key, num_features, num_channels, dtype=jnp.float32):
    """Deterministic nn.Linear-style init: U(-1/sqrt(in), 1/sqrt(in))."""
    kw, kb = jax.random.split(key)
    bound = 1.0 / math.sqrt(num_channels)
    weights = jax.random.uniform(
        kw, (num_features, num_channels, num_channels),
        minval=-bound, maxval=bound, dtype=dtype)
    biases = jax.random.uniform(
        kb, (num_features, num_channels),
        minval=-bound, maxval=bound, dtype=dtype)
    return weights, biases


if __name__ == "__main__":
    key = jax.random.PRNGKey(0)
    kx, kp = jax.random.split(key)

    batch = 2
    num_features = 4
    num_channels = 32

    x = jax.random.normal(kx, (batch, num_features, num_channels),
                          dtype=jnp.float32)
    weights, biases = init_params(kp, num_features, num_channels)

    # Pure-JAX reference matching PyTorch Linear (W is (out, in); y = x@W.T+b).
    ref = (jnp.einsum("bfc,foc->bfo", x, weights,
                      precision=lax.Precision.HIGHEST)
           + biases[None, :, :])

    # High-precision path for a tight numerical check.
    out_hi = jax.block_until_ready(
        channel_fc(x, weights, biases, precision=lax.Precision.HIGHEST))
    assert out_hi.shape == (batch, num_features, num_channels)
    assert jnp.allclose(out_hi, ref, atol=1e-4, rtol=1e-4), \
        float(jnp.max(jnp.abs(out_hi - ref)))

    # Default (fast) MXU precision for f32 operands.
    out_fast = jax.block_until_ready(channel_fc(x, weights, biases))
    assert jnp.allclose(out_fast, ref, atol=5e-2, rtol=5e-2), \
        float(jnp.max(jnp.abs(out_fast - ref)))

    # bf16 fast path (halves weight HBM traffic; f32 accumulate inside kernel).
    out_bf16 = jax.block_until_ready(
        channel_fc(x.astype(jnp.bfloat16), weights.astype(jnp.bfloat16),
                   biases.astype(jnp.bfloat16)))
    assert jnp.allclose(out_bf16.astype(jnp.float32), ref, atol=1e-1, rtol=1e-1)

    print("KERNEL_OK")
</pallas_src>

<mosaic_0001>
module attributes {stable_mosaic.version = 11 : i64} {
  func.func @_channel_fc_kernel(%arg0: i32, %arg1: i32, %arg2: memref<2x128xf32, #tpu.memory_space<vmem>>, %arg3: memref<4x32x32xf32, #tpu.memory_space<vmem>>, %arg4: memref<1x128xf32, #tpu.memory_space<vmem>>, %arg5: memref<2x128xf32, #tpu.memory_space<vmem>>, %arg6: memref<1x128x128xf32, #tpu.memory_space<vmem>>) attributes {dimension_semantics = [#tpu.dimension_semantics<parallel>, #tpu.dimension_semantics<arbitrary>], iteration_bounds = array<i64: 1, 1>, scalar_prefetch = 0 : i64, scratch_operands = 1 : i64, tpu.core_type = #tpu.core_type<tc>, window_params = [{transform_indices = @transform_0, window_bounds = array<i64: 2, 128>}, {transform_indices = @transform_1, window_bounds = array<i64: 4, 32, 32>}, {transform_indices = @transform_2, window_bounds = array<i64: 1, 128>}, {transform_indices = @transform_3, window_bounds = array<i64: 2, 128>}]} {
    %c0_i32 = arith.constant 0 : i32
    %0 = arith.cmpi eq, %arg1, %c0_i32 : i32
    %1 = arith.extui %0 : i1 to i32
    %c0_i32_0 = arith.constant 0 : i32
    %2 = arith.cmpi ne, %1, %c0_i32_0 : i32
    scf.if %2 {
      %cst_9 = arith.constant 0.000000e+00 : f32
      %11 = vector.broadcast %cst_9 : f32 to vector<1x128x128xf32>
      %c0_10 = arith.constant 0 : index
      %c0_11 = arith.constant 0 : index
      %c0_12 = arith.constant 0 : index
      %12 = vector.load %arg6[%c0_10, %c0_11, %c0_12] : memref<1x128x128xf32, #tpu.memory_space<vmem>>, vector<1x128x128xf32>
      tpu.vector_store %arg6[%c0_10, %c0_11, %c0_12], %11 {strides = array<i32>} : memref<1x128x128xf32, #tpu.memory_space<vmem>>, vector<1x128x128xf32>,
      %c0_13 = arith.constant 0 : index
      %c0_14 = arith.constant 0 : index
      %c0_15 = arith.constant 0 : index
      %13 = vector.load %arg3[%c0_13, %c0_14, %c0_15] : memref<4x32x32xf32, #tpu.memory_space<vmem>>, vector<1x32x32xf32>
      %14 = vector.shape_cast %13 : vector<1x32x32xf32> to vector<32x32xf32>
      %c0_16 = arith.constant 0 : index
      %c0_17 = arith.constant 0 : index
      %c0_18 = arith.constant 0 : index
      %15 = vector.load %arg6[%c0_16, %c0_17, %c0_18] : memref<1x128x128xf32, #tpu.memory_space<vmem>>, vector<1x32x32xf32>
      %16 = vector.shape_cast %15 : vector<1x32x32xf32> to vector<32x32xf32>
      %17 = vector.shape_cast %14 : vector<32x32xf32> to vector<1x32x32xf32>
      tpu.vector_store %arg6[%c0_16, %c0_17, %c0_18], %17 {strides = array<i32>} : memref<1x128x128xf32, #tpu.memory_space<vmem>>, vector<1x32x32xf32>,
      %c1 = arith.constant 1 : index
      %c0_19 = arith.constant 0 : index
      %c0_20 = arith.constant 0 : index
      %18 = vector.load %arg3[%c1, %c0_19, %c0_20] : memref<4x32x32xf32, #tpu.memory_space<vmem>>, vector<1x32x32xf32>
      %19 = vector.shape_cast %18 : vector<1x32x32xf32> to vector<32x32xf32>
      %c0_21 = arith.constant 0 : index
      %c32 = arith.constant 32 : index
      %c32_22 = arith.constant 32 : index
      %20 = vector.load %arg6[%c0_21, %c32, %c32_22] : memref<1x128x128xf32, #tpu.memory_space<vmem>>, vector<1x32x32xf32>
      %21 = vector.shape_cast %20 : vector<1x32x32xf32> to vector<32x32xf32>
      %22 = vector.shape_cast %19 : vector<32x32xf32> to vector<1x32x32xf32>
      tpu.vector_store %arg6[%c0_21, %c32, %c32_22], %22 {strides = array<i32>} : memref<1x128x128xf32, #tpu.memory_space<vmem>>, vector<1x32x32xf32>,
      %c2 = arith.constant 2 : index
      %c0_23 = arith.constant 0 : index
      %c0_24 = arith.constant 0 : index
      %23 = vector.load %arg3[%c2, %c0_23, %c0_24] : memref<4x32x32xf32, #tpu.memory_space<vmem>>, vector<1x32x32xf32>
      %24 = vector.shape_cast %23 : vector<1x32x32xf32> to vector<32x32xf32>
      %c0_25 = arith.constant 0 : index
      %c64 = arith.constant 64 : index
      %c64_26 = arith.constant 64 : index
      %25 = vector.load %arg6[%c0_25, %c64, %c64_26] : memref<1x128x128xf32, #tpu.memory_space<vmem>>, vector<1x32x32xf32>
      %26 = vector.shape_cast %25 : vector<1x32x32xf32> to vector<32x32xf32>
      %27 = vector.shape_cast %24 : vector<32x32xf32> to vector<1x32x32xf32>
      tpu.vector_store %arg6[%c0_25, %c64, %c64_26], %27 {strides = array<i32>} : memref<1x128x128xf32, #tpu.memory_space<vmem>>, vector<1x32x32xf32>,
      %c3 = arith.constant 3 : index
      %c0_27 = arith.constant 0 : index
      %c0_28 = arith.constant 0 : index
      %28 = vector.load %arg3[%c3, %c0_27, %c0_28] : memref<4x32x32xf32, #tpu.memory_space<vmem>>, vector<1x32x32xf32>
      %29 = vector.shape_cast %28 : vector<1x32x32xf32> to vector<32x32xf32>
      %c0_29 = arith.constant 0 : index
      %c96 = arith.constant 96 : index
      %c96_30 = arith.constant 96 : index
      %30 = vector.load %arg6[%c0_29, %c96, %c96_30] : memref<1x128x128xf32, #tpu.memory_space<vmem>>, vector<1x32x32xf32>
      %31 = vector.shape_cast %30 : vector<1x32x32xf32> to vector<32x32xf32>
      %32 = vector.shape_cast %29 : vector<32x32xf32> to vector<1x32x32xf32>
      tpu.vector_store %arg6[%c0_29, %c96, %c96_30], %32 {strides = array<i32>} : memref<1x128x128xf32, #tpu.memory_space<vmem>>, vector<1x32x32xf32>,
    } else {
    }
    %c0 = arith.constant 0 : index
    %c0_1 = arith.constant 0 : index
    %3 = vector.load %arg2[%c0, %c0_1] : memref<2x128xf32, #tpu.memory_space<vmem>>, vector<2x128xf32>
    %c0_2 = arith.constant 0 : index
    %c0_3 = arith.constant 0 : index
    %c0_4 = arith.constant 0 : index
    %4 = vector.load %arg6[%c0_2, %c0_3, %c0_4] : memref<1x128x128xf32, #tpu.memory_space<vmem>>, vector<1x128x128xf32>
    %5 = vector.shape_cast %4 : vector<1x128x128xf32> to vector<128x128xf32>
    %cst = arith.constant dense<0.000000e+00> : vector<2x128xf32>
    %6 = tpu.matmul %3, %5, %cst {dimension_numbers = #tpu.dot_dimension_numbers<[1], [1], [0], [0], [0, 0, 1, 0], [], []>, precision = #tpu.contract_precision<fp32>} : vector<2x128xf32>, vector<128x128xf32>, vector<2x128xf32> -> vector<2x128xf32>
    %c0_5 = arith.constant 0 : index
    %c0_6 = arith.constant 0 : index
    %7 = vector.load %arg4[%c0_5, %c0_6] : memref<1x128xf32, #tpu.memory_space<vmem>>, vector<1x128xf32>
    %8 = vector.broadcast %7 : vector<1x128xf32> to vector<2x128xf32>
    %9 = arith.addf %6, %8 : vector<2x128xf32>
    %c0_7 = arith.constant 0 : index
    %c0_8 = arith.constant 0 : index
    %10 = vector.load %arg5[%c0_7, %c0_8] : memref<2x128xf32, #tpu.memory_space<vmem>>, vector<2x128xf32>
    tpu.vector_store %arg5[%c0_7, %c0_8], %9 {strides = array<i32>} : memref<2x128xf32, #tpu.memory_space<vmem>>, vector<2x128xf32>,
    return
  }
  func.func @transform_0(%arg0: i32, %arg1: i32) -> (i32, i32) {
    %c0_i32 = arith.constant 0 : i32
    return %arg1, %arg0 : i32, i32
  }
  func.func @transform_1(%arg0: i32, %arg1: i32) -> (i32, i32, i32) {
    %c0_i32 = arith.constant 0 : i32
    %c0_i32_0 = arith.constant 0 : i32
    %c0_i32_1 = arith.constant 0 : i32
    return %arg0, %c0_i32, %c0_i32_0 : i32, i32, i32
  }
  func.func @transform_2(%arg0: i32, %arg1: i32) -> (i32, i32) {
    %c0_i32 = arith.constant 0 : i32
    %c0_i32_0 = arith.constant 0 : i32
    return %c0_i32, %arg0 : i32, i32
  }
  func.func @transform_3(%arg0: i32, %arg1: i32) -> (i32, i32) {
    %c0_i32 = arith.constant 0 : i32
    return %arg1, %arg0 : i32, i32
  }
}

</mosaic_0001>

<bundles_post_ra>
// kernel: tpu_custom_call.1
= control target key start
LH: loop header
LB: loop body
LE: loop exit
PB: predicated region body
PF: predicated region fallthrough
CT: control target
= control target key end

     0   :  { %8 = vsyncpa [#allocation4], 0  ;;  %s1686_s0 = inlined_call_operand.hbm [shape: f32[2,128], index: 0, kind: input, shape index: {}]   ;;  %s1687_s1 = inlined_call_operand.hbm [shape: f32[4,32,32], index: 1, kind: input, shape index: {}]   ;;  %s1688_s2 = inlined_call_operand.vmem [shape: f32[1,128], index: 2, kind: input, shape index: {}]   ;;  %s1689_s3 = inlined_call_operand.hbm [shape: f32[2,128], index: 3, kind: output, shape index: {}]  }
   0x1   :  { %9 = vsyncpa [#allocation7], 0 }
   0x2   :  { %10 = vsyncpa [#allocation5], 0  ;;  %s1380_s12 = smov [#allocation3]   ;;  %s1381_s14 = smov [#allocation6]  }
   0x3   :  { %s17_s13 = sshll.u32 %s1380_s12, 4  ;;  %s26_s15 = sshll.u32 %s1381_s14, 4  ;;  %s18_s13 = int_to_ptr.vmem [resolvable:$true] %s17_s13  ;;  %s1411_s15 = int_to_ptr.vmem [resolvable:$true] %s26_s15 }
   0x4   :  { %s1308_s18 = scalar_lea.hbm %s1686_s0, 32 }
   0x5   :  { %p1309_p0 = scmp.ne.s32.totalorder %s1686_s0, %s1308_s18  ;;  %p1312_p1 = scmp.lt.u32.totalorder %s1308_s18, %s1686_s0 }
   0x7   :  { %p1314_p2 = pnand %p1312_p1, %p1309_p0 }
   0x9   :  { %1317 = shalt.err (!%p1314_p2)
}
   0xa   :  { %s1318_s23 = scalar_lea.vmem %s18_s13, 32  ;;  %p1323_p4 = scmp.lt.s32.totalorder %s18_s13, %s18_s13 }
   0xb   :  { %p1319_p3 = scmp.ne.s32.totalorder %s18_s13, %s1318_s23  ;;  %p1324_p5 = scmp.lt.s32.totalorder %s1318_s23, %s1318_s23 }
   0xd   :  { %p1325_p6 = por %p1324_p5, %p1323_p4 }
   0xf   :  { %p1326_p7 = pnand %p1325_p6, %p1319_p3 }
  0x11   :  { %1329 = shalt.err (!%p1326_p7)
}
  0x12   :  { %20 = dma.hbm_to_vmem [thread:$0]  %s1686_s0, 32, %s18_s13, [#allocation4]  }
  0x13   :  { %s1330_s28 = scalar_lea.hbm %s1687_s1, 2048 }
  0x14   :  { %p1331_p8 = scmp.ne.s32.totalorder %s1687_s1, %s1330_s28  ;;  %p1334_p9 = scmp.lt.u32.totalorder %s1330_s28, %s1687_s1 }
  0x16   :  { %p1336_p10 = pnand %p1334_p9, %p1331_p8 }
  0x18   :  { %1339 = shalt.err (!%p1336_p10)
}
  0x19   :  { %s1340_s6 = scalar_lea.vmem %s1411_s15, 2048  ;;  %p1345_p12 = scmp.lt.s32.totalorder %s1411_s15, %s1411_s15 }
  0x1a   :  { %p1341_p11 = scmp.ne.s32.totalorder %s1411_s15, %s1340_s6  ;;  %p1346_p13 = scmp.lt.s32.totalorder %s1340_s6, %s1340_s6 }
  0x1c   :  { %p1347_p0 = por %p1346_p13, %p1345_p12 }
  0x1e   :  { %p1348_p1 = pnand %p1347_p0, %p1341_p11 }
  0x20   :  { %1351 = shalt.err (!%p1348_p1)
}
  0x21   :  { %s1382_s0 = smov 128   ;;  %s1383_s7 = smov 8  }
  0x22   :  { %32 = dma.hbm_to_vmem [thread:$0]  %s1687_s1, 2048, %s1411_s15, [#allocation7], %s1382_s0, %s1382_s0, %s1383_s7  }
  0x23   :  { %1374 = dma.done.wait [#allocation4], 32  }
  0x24   :  { %1375 = vsyncadd [#allocation4], 4294967264 }
  0x25   :  { %1376 = dma.done.wait [#allocation7], 2048  }
  0x26   :  { %1377 = vsyncadd [#allocation7], 4294965248  ;;  %v1384_v0 = vmov 0.0|0.0   ;;  %v1385_v1 = vmov 0.0   ;;  %v73_v2 = vld [vmem:[#allocation6 + $0x30] sm:$0xff]  ;;  %v71_v3 = vld [vmem:[#allocation6 + $0x20] sm:$0xff] }
  0x27   :  { %1143 = vmatprep.subr.bf16.mxu1 %v1384_v0  ;;  %1215 = vmatprep.subr.bf16.mxu0 %v1384_v0  ;;  %51 = vst [vmem:[#allocation2 + $0x30] sm:$0xff] %v1385_v1  ;;  %45 = vst [vmem:[#allocation2] sm:$0xff] %v1385_v1  ;;  %s1386_s1 = smov 32   ;;  %v74_v4 = vld [vmem:[#allocation6 + $0x38] sm:$0xff]  ;;  %v72_v5 = vld [vmem:[#allocation6 + $0x28] sm:$0xff]  ;;  %vm65_vm0 = vcmask 261120  }
  0x28   :  { %46 = vst [vmem:[#allocation2 + $0x8] sm:$0xff] %v1385_v1  ;;  %47 = vst [vmem:[#allocation2 + $0x10] sm:$0xff] %v1385_v1  ;;  %83 = vrot.lane.b32.xlu1 %v73_v2, %s1386_s1  ;;  %79 = vrot.lane.b32.xlu0 %v71_v3, %s1386_s1  ;;  %v61_v6 = vld [vmem:[#allocation6] sm:$0xff]  ;;  %v62_v7 = vld [vmem:[#allocation6 + $0x8] sm:$0xff]  ;;  %s1387_s10 = smov 64   ;;  %s1388_s11 = smov 96  }
  0x29   :  { %48 = vst [vmem:[#allocation2 + $0x18] sm:$0xff] %v1385_v1  ;;  %49 = vst [vmem:[#allocation2 + $0x20] sm:$0xff] %v1385_v1  ;;  %v63_v8 = vld [vmem:[#allocation6 + $0x10] sm:$0xff]  ;;  %v64_v9 = vld [vmem:[#allocation6 + $0x18] sm:$0xff]  ;;  %vm1389_vm1 = vmmov 0   ;;  %vm91_vm2 = vcmask 523520  }
  0x2a   :  { %50 = vst [vmem:[#allocation2 + $0x28] sm:$0xff] %v1385_v1  ;;  %52 = vst [vmem:[#allocation2 + $0x38] sm:$0xff] %v1385_v1  ;;  %v98_v10 = vld [vmem:[#allocation6 + $0x48] sm:$0xff]  ;;  %v97_v11 = vld [vmem:[#allocation6 + $0x40] sm:$0xff]  ;;  %965 = vmatprep.mubr.msk.f32.mxu1 %vm1389_vm1, %v1385_v1  ;;  %1070 = vmatprep.mubr.msk.f32.mxu0 %vm1389_vm1, %v1385_v1  ;;  %vm117_vm3 = vcmask 785920   ;;  %vm143_vm4 = vcmask 1048320  }
  0x2b   :  { %53 = vst [vmem:[#allocation2 + $0x40] sm:$0xff] %v1385_v1  ;;  %54 = vst [vmem:[#allocation2 + $0x48] sm:$0xff] %v1385_v1  ;;  %v100_v12 = vld [vmem:[#allocation6 + $0x58] sm:$0xff]  ;;  %v99_v13 = vld [vmem:[#allocation6 + $0x50] sm:$0xff]  ;;  %s1390_s14 = smov [#allocation8]  }
  0x2c   :  { %55 = vst [vmem:[#allocation2 + $0x50] sm:$0xff] %v1385_v1  ;;  %56 = vst [vmem:[#allocation2 + $0x58] sm:$0xff] %v1385_v1  ;;  %85 = vrot.lane.b32.xlu1 %v74_v4, %s1386_s1  ;;  %81 = vrot.lane.b32.xlu0 %v72_v5, %s1386_s1  ;;  %v124_v21 = vld [vmem:[#allocation6 + $0x68] sm:$0xff]  ;;  %v123_v22 = vld [vmem:[#allocation6 + $0x60] sm:$0xff]  ;;  %s820_s15 = sshll.u32 %s1390_s14, 4  ;;  %s821_s15 = int_to_ptr.vmem [resolvable:$true] %s820_s15 }
  0x2d   :  { %57 = vst [vmem:[#allocation2 + $0x60] sm:$0xff] %v1385_v1  ;;  %58 = vst [vmem:[#allocation2 + $0x68] sm:$0xff] %v1385_v1  ;;  %v126_v29 = vld [vmem:[#allocation6 + $0x78] sm:$0xff]  ;;  %v125_v30 = vld [vmem:[#allocation6 + $0x70] sm:$0xff]  ;;  %s1352_s16 = scalar_lea.vmem %s821_s15, 32  ;;  %p1357_p3 = scmp.lt.s32.totalorder %s821_s15, %s821_s15 }
  0x2e   :  { %59 = vst [vmem:[#allocation2 + $0x70] sm:$0xff] %v1385_v1  ;;  %60 = vst [vmem:[#allocation2 + $0x78] sm:$0xff] %v1385_v1  ;;  %p1353_p2 = scmp.ne.s32.totalorder %s821_s15, %s1352_s16  ;;  %p1358_p4 = scmp.lt.s32.totalorder %s1352_s16, %s1352_s16 }
  0x2f   :  { %66 = vst.msk [vmem:[#allocation2] sm:$0xff] %vm65_vm0, %v61_v6  ;;  %67 = vst.msk [vmem:[#allocation2 + $0x8] sm:$0xff] %vm65_vm0, %v62_v7 }
  0x30   :  { %68 = vst.msk [vmem:[#allocation2 + $0x10] sm:$0xff] %vm65_vm0, %v63_v8  ;;  %69 = vst.msk [vmem:[#allocation2 + $0x18] sm:$0xff] %vm65_vm0, %v64_v9  ;;  %107 = vrot.lane.b32.xlu1 %v98_v10, %s1387_s10  ;;  %105 = vrot.lane.b32.xlu0 %v97_v11, %s1387_s10  ;;  %p1359_p5 = por %p1358_p4, %p1357_p3 }
  0x32   :  { %p1360_p6 = pnand %p1359_p5, %p1353_p2 }
  0x34   :  { %111 = vrot.lane.b32.xlu1 %v100_v12, %s1387_s10  ;;  %109 = vrot.lane.b32.xlu0 %v99_v13, %s1387_s10 }
  0x36   :  { %v149_v14 = vld [vmem:[#allocation2] sm:$0xff]  ;;  %v150_v15 = vld [vmem:[#allocation2 + $0x8] sm:$0xff] }
  0x37   :  { %v151_v16 = vld [vmem:[#allocation2 + $0x10] sm:$0xff]  ;;  %v173_v17 = vand.u32 4294901760, %v149_v14  ;;  %v176_v18 = vand.u32 4294901760, %v150_v15  ;;  %v152_v19 = vld [vmem:[#allocation2 + $0x18] sm:$0xff] }
  0x38   :  { %v179_v20 = vand.u32 4294901760, %v151_v16  ;;  %v182_v23 = vand.u32 4294901760, %v152_v19  ;;  %133 = vrot.lane.b32.xlu1 %v124_v21, %s1388_s11  ;;  %131 = vrot.lane.b32.xlu0 %v123_v22, %s1388_s11 }
  0x39   :  { %v1460_v24 = vpack.c.bf16 %v176_v18, %v173_v17  ;;  %v1462_v25 = vsub.f32 %v149_v14, %v173_v17  ;;  %v1464_v26 = vsub.f32 %v150_v15, %v176_v18 }
  0x3a   :  { %v1466_v27 = vsub.f32 %v151_v16, %v179_v20  ;;  %v1468_v28 = vsub.f32 %v152_v19, %v182_v23  ;;  %v1474_v31 = vpack.c.bf16 %v182_v23, %v179_v20 }
  0x3b   :  { %1145 = vmatpush3.bf16.xpose.msra.mxu1 %v1460_v24  ;;  %1217 = vmatpush3.bf16.xpose.msra.mxu0 %v1460_v24 }
  0x3c   :  { %1146 = vmatprep.subr.bf16.mxu1 %v1384_v0  ;;  %1218 = vmatprep.subr.bf16.mxu0 %v1384_v0 }
  0x3d   :  { %137 = vrot.lane.b32.xlu1 %v126_v29, %s1388_s11  ;;  %135 = vrot.lane.b32.xlu0 %v125_v30, %s1388_s11 }
  0x43   :  { %1148 = vmatpush3.bf16.xpose.msra.mxu1 %v1474_v31  ;;  %1220 = vmatpush3.bf16.xpose.msra.mxu0 %v1474_v31 }
  0x44   :  { %1149 = vmatprep.subr.bf16.mxu1 %v1384_v0  ;;  %1221 = vmatprep.subr.bf16.mxu0 %v1384_v0 }
  0x9a   :  { %v84_v32 = vpop.permute.xlu1 %83  ;;  %v80_v33 = vpop.permute.xlu0 %79 }
  0x9b   :  { %94 = vst.msk [vmem:[#allocation2 + $0x30] sm:$0xff] %vm91_vm2, %v84_v32  ;;  %92 = vst.msk [vmem:[#allocation2 + $0x20] sm:$0xff] %vm91_vm2, %v80_v33 }
  0x9e   :  { %v86_v34 = vpop.permute.xlu1 %85  ;;  %v82_v35 = vpop.permute.xlu0 %81 }
  0x9f   :  { %95 = vst.msk [vmem:[#allocation2 + $0x38] sm:$0xff] %vm91_vm2, %v86_v34  ;;  %93 = vst.msk [vmem:[#allocation2 + $0x28] sm:$0xff] %vm91_vm2, %v82_v35  ;;  %v148_v34 = vld [vmem:[#allocation3] sm:$0x3] }
  0xa0   :  { %v1548_v35 = vand.u32 4294901760, %v148_v34 }
  0xa2   :  { %v108_v36 = vpop.permute.xlu1 %107  ;;  %v106_v37 = vpop.permute.xlu0 %105  ;;  %v153_v38 = vld [vmem:[#allocation2 + $0x20] sm:$0xff]  ;;  %v155_v39 = vld [vmem:[#allocation2 + $0x30] sm:$0xff] }
  0xa3   :  { %119 = vst.msk [vmem:[#allocation2 + $0x48] sm:$0xff] %vm117_vm3, %v108_v36  ;;  %118 = vst.msk [vmem:[#allocation2 + $0x40] sm:$0xff] %vm117_vm3, %v106_v37  ;;  %v185_v41 = vand.u32 4294901760, %v153_v38  ;;  %v191_v45 = vand.u32 4294901760, %v155_v39  ;;  %v1553_v37 = vsub.f32 %v148_v34, %v1548_v35 }
  0xa5   :  { %v1488_v50 = vsub.f32 %v153_v38, %v185_v41  ;;  %v1490_v51 = vsub.f32 %v155_v39, %v191_v45  ;;  %v266_v38 = vand.u32 4294901760, %v1462_v25  ;;  %v273_v39 = vand.u32 4294901760, %v1464_v26 }
  0xa6   :  { %v154_v40 = vld [vmem:[#allocation2 + $0x28] sm:$0xff]  ;;  %v112_v42 = vpop.permute.xlu1 %111  ;;  %v110_v43 = vpop.permute.xlu0 %109  ;;  %v156_v44 = vld [vmem:[#allocation2 + $0x38] sm:$0xff] }
  0xa7   :  { %v188_v46 = vand.u32 4294901760, %v154_v40  ;;  %121 = vst.msk [vmem:[#allocation2 + $0x58] sm:$0xff] %vm117_vm3, %v112_v42  ;;  %120 = vst.msk [vmem:[#allocation2 + $0x50] sm:$0xff] %vm117_vm3, %v110_v43  ;;  %v194_v47 = vand.u32 4294901760, %v156_v44  ;;  %v267_v42 = vsub.f32 %v1462_v25, %v266_v38  ;;  %v274_v43 = vsub.f32 %v1464_v26, %v273_v39 }
  0xa9   :  { %v1484_v48 = vpack.c.bf16 %v188_v46, %v185_v41  ;;  %v1486_v49 = vsub.f32 %v154_v40, %v188_v46  ;;  %v1492_v52 = vsub.f32 %v156_v44, %v194_v47  ;;  %v1512_v8 = vpack.c.bf16 %v194_v47, %v191_v45 }
  0xaa   :  { %v134_v53 = vpop.permute.xlu1 %133  ;;  %v132_v54 = vpop.permute.xlu0 %131  ;;  %v157_v55 = vld [vmem:[#allocation2 + $0x40] sm:$0xff]  ;;  %v158_v56 = vld [vmem:[#allocation2 + $0x48] sm:$0xff]  ;;  %v255_v40 = vand.u32 4294901760, %v1553_v37  ;;  %v268_v45 = vand.u32 4294901760, %v267_v42  ;;  %v275_v46 = vand.u32 4294901760, %v274_v43  ;;  %v280_v47 = vand.u32 4294901760, %v1466_v27 }
  0xab   :  { %1151 = vmatpush3.bf16.xpose.msra.mxu1 %v1484_v48  ;;  %1223 = vmatpush3.bf16.xpose.msra.mxu0 %v1484_v48  ;;  %145 = vst.msk [vmem:[#allocation2 + $0x68] sm:$0xff] %vm143_vm4, %v134_v53  ;;  %144 = vst.msk [vmem:[#allocation2 + $0x60] sm:$0xff] %vm143_vm4, %v132_v54  ;;  %v197_v57 = vand.u32 4294901760, %v157_v55  ;;  %v200_v58 = vand.u32 4294901760, %v158_v56  ;;  %v1198_v59 = vpack.c.bf16 %v1486_v49, %v1488_v50  ;;  %v287_v53 = vand.u32 4294901760, %v1468_v28 }
  0xac   :  { %1152 = vmatprep.subr.bf16.mxu1 %v1384_v0  ;;  %1224 = vmatprep.subr.bf16.mxu0 %v1384_v0  ;;  %v1201_v60 = vpack.c.bf16 %v1492_v52, %v1490_v51  ;;  %v256_v44 = vsub.f32 %v1553_v37, %v255_v40 }
  0xad   :  { %v1504_v61 = vsub.f32 %v157_v55, %v197_v57  ;;  %v1506_v62 = vsub.f32 %v158_v56, %v200_v58  ;;  %v1528_v20 = vpack.c.bf16 %v200_v58, %v197_v57  ;;  %v1168_v55 = vpack.c.bf16 %v275_v46, %v268_v45 }
  0xae   :  { %v159_v3 = vld [vmem:[#allocation2 + $0x50] sm:$0xff]  ;;  %v160_v4 = vld [vmem:[#allocation2 + $0x58] sm:$0xff]  ;;  %v257_v54 = vand.u32 4294901760, %v256_v44  ;;  %v1240_v56 = vpack.c.bf16 %v273_v39, %v266_v38  ;;  %v281_v57 = vsub.f32 %v1466_v27, %v280_v47  ;;  %v288_v58 = vsub.f32 %v1468_v28, %v287_v53 }
  0xaf   :  { %v138_v63 = vpop.permute.xlu1 %137  ;;  %v136_v2 = vpop.permute.xlu0 %135  ;;  %v203_v5 = vand.u32 4294901760, %v159_v3  ;;  %v206_v6 = vand.u32 4294901760, %v160_v4  ;;  %v1204_v7 = vpack.c.bf16 %v1506_v62, %v1504_v61  ;;  %v322_v42 = vand.u32 4294901760, %v1504_v61 }
  0xb0   :  { %147 = vst.msk [vmem:[#allocation2 + $0x78] sm:$0xff] %vm143_vm4, %v138_v63  ;;  %146 = vst.msk [vmem:[#allocation2 + $0x70] sm:$0xff] %vm143_vm4, %v136_v2  ;;  %v282_v63 = vand.u32 4294901760, %v281_v57  ;;  %v289_v2 = vand.u32 4294901760, %v288_v58  ;;  %v329_v43 = vand.u32 4294901760, %v1506_v62 }
  0xb1   :  { %v1514_v9 = vsub.f32 %v159_v3, %v203_v5  ;;  %v1516_v10 = vsub.f32 %v160_v4, %v206_v6  ;;  %v1542_v33 = vpack.c.bf16 %v206_v6, %v203_v5  ;;  %v301_v3 = vand.u32 4294901760, %v1486_v49 }
  0xb2   :  { %v161_v11 = vld [vmem:[#allocation2 + $0x60] sm:$0xff]  ;;  %v162_v12 = vld [vmem:[#allocation2 + $0x68] sm:$0xff]  ;;  %v1171_v4 = vpack.c.bf16 %v289_v2, %v282_v63  ;;  %v1243_v5 = vpack.c.bf16 %v287_v53, %v280_v47  ;;  %v294_v6 = vand.u32 4294901760, %v1488_v50  ;;  %v323_v46 = vsub.f32 %v1504_v61, %v322_v42 }
  0xb3   :  { %1154 = vmatpush3.bf16.xpose.msra.mxu1 %v1512_v8  ;;  %1226 = vmatpush3.bf16.xpose.msra.mxu0 %v1512_v8  ;;  %v209_v13 = vand.u32 4294901760, %v161_v11  ;;  %v212_v14 = vand.u32 4294901760, %v162_v12  ;;  %v1207_v15 = vpack.c.bf16 %v1516_v10, %v1514_v9  ;;  %v330_v47 = vsub.f32 %v1506_v62, %v329_v43 }
  0xb4   :  { %1155 = vmatprep.subr.bf16.mxu1 %v1384_v0  ;;  %1227 = vmatprep.subr.bf16.mxu0 %v1384_v0  ;;  %v324_v53 = vand.u32 4294901760, %v323_v46  ;;  %v1252_v58 = vpack.c.bf16 %v329_v43, %v322_v42  ;;  %v1192_v46 = vpack.c.bf16 %v1464_v26, %v1462_v25  ;;  %v1195_v25 = vpack.c.bf16 %v1468_v28, %v1466_v27 }
  0xb5   :  { %v1524_v16 = vsub.f32 %v161_v11, %v209_v13  ;;  %v1526_v17 = vsub.f32 %v162_v12, %v212_v14  ;;  %v1550_v36 = vpack.c.bf16 %v212_v14, %v209_v13  ;;  %v302_v11 = vsub.f32 %v1486_v49, %v301_v3 }
  0xb6   :  { %v295_v12 = vsub.f32 %v1488_v50, %v294_v6  ;;  %v308_v14 = vand.u32 4294901760, %v1490_v51 }
  0xb7   :  { %v163_v18 = vld [vmem:[#allocation2 + $0x70] sm:$0xff]  ;;  %v164_v19 = vld [vmem:[#allocation2 + $0x78] sm:$0xff]  ;;  %v1210_v23 = vpack.c.bf16 %v1526_v17, %v1524_v16  ;;  %v303_v13 = vand.u32 4294901760, %v302_v11 }
  0xb8   :  { %v215_v21 = vand.u32 4294901760, %v163_v18  ;;  %v218_v22 = vand.u32 4294901760, %v164_v19  ;;  %v309_v34 = vsub.f32 %v1490_v51, %v308_v14 }
  0xba   :  { %v1532_v29 = vsub.f32 %v163_v18, %v215_v21  ;;  %v1534_v30 = vsub.f32 %v164_v19, %v218_v22  ;;  %v1562_v41 = vpack.c.bf16 %v218_v22, %v215_v21  ;;  %v315_v18 = vand.u32 4294901760, %v1492_v52 }
  0xbb   :  { %1157 = vmatpush3.bf16.xpose.msra.mxu1 %v1528_v20  ;;  %1229 = vmatpush3.bf16.xpose.msra.mxu0 %v1528_v20  ;;  %v296_v19 = vand.u32 4294901760, %v295_v12  ;;  %v1246_v22 = vpack.c.bf16 %v301_v3, %v294_v6  ;;  %v310_v39 = vand.u32 4294901760, %v309_v34  ;;  %v357_v6 = vand.u32 4294901760, %v1526_v17 }
  0xbc   :  { %v1213_v32 = vpack.c.bf16 %v1534_v30, %v1532_v29  ;;  %1158 = vmatprep.subr.bf16.mxu1 %v1384_v0  ;;  %1230 = vmatprep.subr.bf16.mxu0 %v1384_v0  ;;  %v316_v38 = vsub.f32 %v1492_v52, %v315_v18  ;;  %v1249_v45 = vpack.c.bf16 %v315_v18, %v308_v14 }
  0xbd   :  { %v1174_v21 = vpack.c.bf16 %v303_v13, %v296_v19  ;;  %v358_v14 = vsub.f32 %v1526_v17, %v357_v6 }
  0xbf   :  { %v359_v19 = vand.u32 4294901760, %v358_v14 }
  0xc3   :  { %1160 = vmatpush3.bf16.xpose.msra.mxu1 %v1542_v33  ;;  %1232 = vmatpush3.bf16.xpose.msra.mxu0 %v1542_v33 }
  0xc4   :  { %1161 = vmatprep.subr.bf16.mxu1 %v1384_v0  ;;  %1233 = vmatprep.subr.bf16.mxu0 %v1384_v0 }
  0xcb   :  { %1163 = vmatpush3.bf16.xpose.msra.mxu1 %v1550_v36  ;;  %1235 = vmatpush3.bf16.xpose.msra.mxu0 %v1550_v36 }
  0xcc   :  { %1164 = vmatprep.subr.bf16.mxu1 %v1384_v0  ;;  %1236 = vmatprep.subr.bf16.mxu0 %v1384_v0 }
  0xd3   :  { %1166 = vmatpush3.bf16.xpose.msra.mxu1 %v1562_v41  ;;  %1238 = vmatpush3.bf16.xpose.msra.mxu0 %v1562_v41 }
  0xd4   :  { %1167 = vmatprep.subr.bf16.mxu1 %v1384_v0  ;;  %1239 = vmatprep.subr.bf16.mxu0 %v1384_v0 }
  0xda   :  { %966 = vmatmul.mubr.f32.vlgmr.msra.gmra.mrb[0].mxu1 %v257_v54  ;;  %1071 = vmatmul.mubr.f32.vlgmr.msra.gmra.mrb[0].mxu0 %v255_v40  ;;  %v317_v40 = vand.u32 4294901760, %v316_v38  ;;  %v331_v54 = vand.u32 4294901760, %v330_v47 }
  0xdb   :  { %1169 = vmatpush3.bf16.xpose.msra.mxu1 %v1168_v55  ;;  %1241 = vmatpush3.bf16.xpose.msra.mxu0 %v1240_v56  ;;  %v336_v55 = vand.u32 4294901760, %v1514_v9  ;;  %v343_v56 = vand.u32 4294901760, %v1516_v10 }
  0xdc   :  { %1170 = vmatprep.subr.bf16.mxu1 %v1384_v0  ;;  %1242 = vmatprep.subr.bf16.mxu0 %v1384_v0  ;;  %v1177_v44 = vpack.c.bf16 %v317_v40, %v310_v39  ;;  %v1180_v57 = vpack.c.bf16 %v331_v54, %v324_v53 }
  0xdd   :  { %1000 = vmatprep.mubr.msk.f32.mxu1 %vm1389_vm1, %v1385_v1  ;;  %1105 = vmatprep.mubr.msk.f32.mxu0 %vm1389_vm1, %v1385_v1  ;;  %v337_v63 = vsub.f32 %v1514_v9, %v336_v55  ;;  %v344_v2 = vsub.f32 %v1516_v10, %v343_v56  ;;  %v1255_v12 = vpack.c.bf16 %v343_v56, %v336_v55 }
  0xdf   :  { %v338_v3 = vand.u32 4294901760, %v337_v63 }
  0xe3   :  { %1172 = vmatpush3.bf16.xpose.msra.mxu1 %v1171_v4  ;;  %1244 = vmatpush3.bf16.xpose.msra.mxu0 %v1243_v5  ;;  %v345_v4 = vand.u32 4294901760, %v344_v2  ;;  %v350_v5 = vand.u32 4294901760, %v1524_v16 }
  0xe4   :  { %1173 = vmatprep.subr.bf16.mxu1 %v1384_v0  ;;  %1245 = vmatprep.subr.bf16.mxu0 %v1384_v0 }
  0xe5   :  { %v1183_v11 = vpack.c.bf16 %v345_v4, %v338_v3  ;;  %v351_v13 = vsub.f32 %v1524_v16, %v350_v5  ;;  %v1258_v38 = vpack.c.bf16 %v357_v6, %v350_v5 }
  0xe7   :  { %v352_v18 = vand.u32 4294901760, %v351_v13 }
  0xe9   :  { %v1186_v34 = vpack.c.bf16 %v359_v19, %v352_v18 }
  0xeb   :  { %1175 = vmatpush3.bf16.xpose.msra.mxu1 %v1174_v21  ;;  %1247 = vmatpush3.bf16.xpose.msra.mxu0 %v1246_v22  ;;  %v364_v21 = vand.u32 4294901760, %v1532_v29  ;;  %v371_v22 = vand.u32 4294901760, %v1534_v30 }
  0xec   :  { %1176 = vmatprep.subr.bf16.mxu1 %v1384_v0  ;;  %1248 = vmatprep.subr.bf16.mxu0 %v1384_v0 }
  0xed   :  { %v365_v39 = vsub.f32 %v1532_v29, %v364_v21  ;;  %v372_v40 = vsub.f32 %v1534_v30, %v371_v22 }
  0xef   :  { %v366_v42 = vand.u32 4294901760, %v365_v39  ;;  %v373_v43 = vand.u32 4294901760, %v372_v40 }
  0xf3   :  { %1178 = vmatpush3.bf16.xpose.msra.mxu1 %v1177_v44  ;;  %1250 = vmatpush3.bf16.xpose.msra.mxu0 %v1249_v45  ;;  %v1189_v44 = vpack.c.bf16 %v373_v43, %v366_v42  ;;  %v1261_v45 = vpack.c.bf16 %v371_v22, %v364_v21 }
  0xf4   :  { %1179 = vmatprep.subr.bf16.mxu1 %v1384_v0  ;;  %1251 = vmatprep.subr.bf16.mxu0 %v1384_v0 }
  0xfb   :  { %1181 = vmatpush3.bf16.xpose.msra.mxu1 %v1180_v57  ;;  %1253 = vmatpush3.bf16.xpose.msra.mxu0 %v1252_v58 }
  0xfc   :  { %1182 = vmatprep.subr.bf16.mxu1 %v1384_v0  ;;  %1254 = vmatprep.subr.bf16.mxu0 %v1384_v0 }
 0x103   :  { %1184 = vmatpush3.bf16.xpose.msra.mxu1 %v1183_v11  ;;  %1256 = vmatpush3.bf16.xpose.msra.mxu0 %v1255_v12 }
 0x104   :  { %1185 = vmatprep.subr.bf16.mxu1 %v1384_v0  ;;  %1257 = vmatprep.subr.bf16.mxu0 %v1384_v0 }
 0x10b   :  { %1187 = vmatpush3.bf16.xpose.msra.mxu1 %v1186_v34  ;;  %1259 = vmatpush3.bf16.xpose.msra.mxu0 %v1258_v38 }
 0x10c   :  { %1188 = vmatprep.subr.bf16.mxu1 %v1384_v0  ;;  %1260 = vmatprep.subr.bf16.mxu0 %v1384_v0 }
 0x113   :  { %1190 = vmatpush3.bf16.xpose.msra.mxu1 %v1189_v44  ;;  %1262 = vmatpush3.bf16.xpose.msra.mxu0 %v1261_v45 }
 0x114   :  { %1191 = vmatprep.subr.bf16.mxu1 %v1384_v0  ;;  %1263 = vmatprep.subr.bf16.mxu0 %v1384_v0 }
 0x11a   :  { %1001 = vmatmul.mubr.f32.vlgmr.msra.gmra.mrb[0].mxu1 %v1548_v35  ;;  %1106 = vmatmul.mubr.f32.vlgmr.msra.gmra.mrb[0].mxu0 %v1548_v35 }
 0x11b   :  { %1193 = vmatpush3.bf16.xpose.msra.mxu1 %v1192_v46  ;;  %1265 = vmatpush3.bf16.xpose.msra.mxu0 %v1460_v24 }
 0x11c   :  { %1194 = vmatprep.subr.bf16.mxu1 %v1384_v0  ;;  %1266 = vmatprep.subr.bf16.mxu0 %v1384_v0 }
 0x11d   :  { %1035 = vmatprep.mubr.msk.f32.mxu1 %vm1389_vm1, %v1385_v1  ;;  %1140 = vmatprep.mubr.msk.f32.mxu0 %vm1389_vm1, %v1385_v1  ;;  %v830_v1 = vld [vmem:[%s1688_s2] ss:$0 sm:$0xff] }
 0x123   :  { %1196 = vmatpush3.bf16.xpose.msra.mxu1 %v1195_v25  ;;  %1268 = vmatpush3.bf16.xpose.msra.mxu0 %v1474_v31 }
 0x124   :  { %1197 = vmatprep.subr.bf16.mxu1 %v1384_v0  ;;  %1269 = vmatprep.subr.bf16.mxu0 %v1384_v0 }
 0x12b   :  { %1199 = vmatpush3.bf16.xpose.msra.mxu1 %v1198_v59  ;;  %1271 = vmatpush3.bf16.xpose.msra.mxu0 %v1484_v48 }
 0x12c   :  { %1200 = vmatprep.subr.bf16.mxu1 %v1384_v0  ;;  %1272 = vmatprep.subr.bf16.mxu0 %v1384_v0 }
 0x133   :  { %1202 = vmatpush3.bf16.xpose.msra.mxu1 %v1201_v60  ;;  %1274 = vmatpush3.bf16.xpose.msra.mxu0 %v1512_v8 }
 0x134   :  { %1203 = vmatprep.subr.bf16.mxu1 %v1384_v0  ;;  %1275 = vmatprep.subr.bf16.mxu0 %v1384_v0 }
 0x13b   :  { %1205 = vmatpush3.bf16.xpose.msra.mxu1 %v1204_v7  ;;  %1277 = vmatpush3.bf16.xpose.msra.mxu0 %v1528_v20 }
 0x13c   :  { %1206 = vmatprep.subr.bf16.mxu1 %v1384_v0  ;;  %1278 = vmatprep.subr.bf16.mxu0 %v1384_v0 }
 0x143   :  { %1208 = vmatpush3.bf16.xpose.msra.mxu1 %v1207_v15  ;;  %1280 = vmatpush3.bf16.xpose.msra.mxu0 %v1542_v33 }
 0x144   :  { %1209 = vmatprep.subr.bf16.mxu1 %v1384_v0  ;;  %1281 = vmatprep.subr.bf16.mxu0 %v1384_v0 }
 0x14b   :  { %1211 = vmatpush3.bf16.xpose.msra.mxu1 %v1210_v23  ;;  %1283 = vmatpush3.bf16.xpose.msra.mxu0 %v1550_v36 }
 0x14c   :  { %1212 = vmatprep.subr.bf16.mxu1 %v1384_v0  ;;  %1284 = vmatprep.subr.bf16.mxu0 %v1384_v0 }
 0x153   :  { %1214 = vmatpush3.bf16.xpose.msra.mxu1 %v1213_v32  ;;  %1286 = vmatpush3.bf16.xpose.msra.mxu0 %v1562_v41 }
 0x15a   :  { %1036 = vmatmul.mubr.f32.vlgmr.msra.gmra.mrb[0].mxu1 %v1553_v37  ;;  %1141 = vmatmul.mubr.f32.vlgmr.msra.gmra.mrb[0].mxu0 %v1548_v35 }
 0x22d   :  { %v514_v24 = vpop.f32.mrb[0].mxu1  ;;  %v809_v26 = vpop.f32.mrb[0].mxu0 }
 0x22e   :  { %v1287_v27 = vadd.f32 %v830_v1, %v514_v24  ;;  %v1037_v0 = vpop.f32.mrb[1].mxu1  ;;  %v1142_v28 = vpop.f32.mrb[1].mxu0 }
 0x230   :  { %v1288_v31 = vadd.f32 %v1287_v27, %v809_v26 }
 0x232   :  { %813 = vst [vmem:[#allocation8] sm:$0x3] %v1288_v31 }
 0x233   :  { %1363 = shalt.err (!%p1360_p6)
}
 0x234   :  { %s1364_s2 = scalar_lea.hbm %s1689_s3, 32 }
 0x235   :  { %p1365_p7 = scmp.ne.s32.totalorder %s1689_s3, %s1364_s2  ;;  %p1368_p8 = scmp.lt.u32.totalorder %s1364_s2, %s1689_s3 }
 0x237   :  { %p1370_p9 = pnand %p1368_p8, %p1365_p7 }
 0x239   :  { %1373 = shalt.err (!%p1370_p9)
}
 0x23a   :  { %823 = dma.vmem_to_hbm [thread:$0]  %s821_s15, 32, %s1689_s3, [#allocation5]  }
 0x23b   :  { %1378 = dma.done.wait [#allocation5], 32  }
 0x23c   :  { %1379 = vsyncadd [#allocation5], 4294967264 }
 0x23d   :  { %827 = vsyncpa [#allocation4], 1 }
 0x23e   :  { %828 = vsyncpa [#allocation7], 1 }
 0x23f   :  { %829 = vsyncpa [#allocation5], 1 }

</bundles_post_ra>
